<compile_context>
chip_gen: v7x
topology: tpu7x:2x2x1
jax: 0.10.0
libtpu: 0.0.40
codegen_flags: <defaults>
</compile_context>

<pallas_src>
import math

import jax
import jax.numpy as jnp
from jax.experimental import pallas as pl
from jax.experimental.pallas import tpu as pltpu

LANES = 128


# --------------------------------- kernel ---------------------------------

def dqn_kernel(e_ref, k_ref, w7_ref, w8_ref, wB_ref, wC_ref,
               bA_ref, bB_ref, bC_ref, out_ref):
    f32 = jnp.float32
    bf16 = jnp.bfloat16
    e_in = e_ref[...].astype(bf16)                       # (TB, de_in)
    k_in = k_ref[...].astype(bf16)                       # (TB, dk_in)

    # fc7 | fc8 fused along output lanes: e -> lanes [0,d_e), k -> [d_e,d_e+te)
    ek = (jnp.dot(e_in, w7_ref[...], preferred_element_type=f32)
          + jnp.dot(k_in, w8_ref[...], preferred_element_type=f32)
          + bA_ref[...])                                 # (TB, 128) f32

    # fc1 | fc2 fused (N = 256) + ReLU: x -> lanes [0,128), y -> [128,128+h2)
    xy = jnp.maximum(
        jnp.dot(ek.astype(bf16), wB_ref[...], preferred_element_type=f32)
        + bB_ref[...], 0.0)                              # (TB, 256) f32

    # fc4 fused over K = 256 ([x | y]); padded output lanes carry the -1e30
    # softmax mask baked into bC, so no iota/where is needed here.
    logits = (jnp.dot(xy.astype(bf16), wC_ref[...], preferred_element_type=f32)
              + bC_ref[...])                             # (TB, 128) f32

    m = jnp.max(logits, axis=-1, keepdims=True)
    ex = jnp.exp(logits - m)
    out_ref[...] = ex / jnp.sum(ex, axis=-1, keepdims=True)


# --------------------------------- wrapper --------------------------------

def dqn_forward(e_flat, k_flat, p, n_out, *, tb_max=512):
    """e_flat: (B, de_in) f32, k_flat: (B, dk_in) f32 -> (B, n_out) probs."""
    b, de_in = e_flat.shape
    dk_in = k_flat.shape[1]

    # Batch tiling: big tiles to amortize per-grid-step overhead, but keep at
    # least 2 grid steps when >=256 rows so v7x's two TensorCores both work.
    n128 = max(1, (b + 127) // 128)                      # 128-row subtiles
    tiles_per_step = max(1, min(tb_max // 128, n128))
    if n128 >= 2:
        tiles_per_step = min(tiles_per_step, (n128 + 1) // 2)
    tb = tiles_per_step * 128
    steps = (n128 + tiles_per_step - 1) // tiles_per_step
    b_pad = steps * tb
    if b_pad != b:
        e_flat = jnp.pad(e_flat, ((0, b_pad - b), (0, 0)))
        k_flat = jnp.pad(k_flat, ((0, b_pad - b), (0, 0)))

    def resident(arr):                                   # VMEM-resident block
        return pl.BlockSpec(arr.shape, lambda i: (0, 0))

    out = pl.pallas_call(
        dqn_kernel,
        out_shape=jax.ShapeDtypeStruct((b_pad, LANES), jnp.float32),
        grid=(steps,),
        in_specs=[
            pl.BlockSpec((tb, de_in), lambda i: (i, 0)),     # e stream
            pl.BlockSpec((tb, dk_in), lambda i: (i, 0)),     # k stream
            resident(p["w7"]), resident(p["w8"]),
            resident(p["wB"]), resident(p["wC"]),
            resident(p["bA"]), resident(p["bB"]), resident(p["bC"]),
        ],
        out_specs=pl.BlockSpec((tb, LANES), lambda i: (i, 0)),
        compiler_params=pltpu.CompilerParams(
            dimension_semantics=("parallel",)),
    )(e_flat, k_flat, p["w7"], p["w8"], p["wB"], p["wC"],
      p["bA"], p["bB"], p["bC"])
    return out[:b, :n_out]


# ---------------- parameter init + packing (deterministic) ----------------

def _linear_params(key, in_f, out_f):
    """kaiming_uniform weight (as in the module) + default PyTorch bias init.
    Returned weight is transposed to (in_f, out_f); bias shaped (out_f,)."""
    kw, kb = jax.random.split(key)
    w_bound = math.sqrt(6.0 / in_f)                      # kaiming_uniform_, a=0
    w = jax.random.uniform(kw, (out_f, in_f), jnp.float32, -w_bound, w_bound)
    b_bound = 1.0 / math.sqrt(in_f)
    b = jax.random.uniform(kb, (out_f,), jnp.float32, -b_bound, b_bound)
    return w.T, b


def init_dqn_params(key, neighbors_num, task_em_size, device_num):
    d_e = neighbors_num * 3 + 3
    h2 = task_em_size * 3
    keys = jax.random.split(key, 5)
    w1, b1 = _linear_params(keys[0], d_e, 128)
    w2, b2 = _linear_params(keys[1], task_em_size, h2)
    w4, b4 = _linear_params(keys[2], 128 + h2, neighbors_num + 1)
    w7, b7 = _linear_params(keys[3], d_e * device_num, d_e)
    w8, b8 = _linear_params(keys[4], task_em_size * device_num, task_em_size)
    return {"w1": w1, "b1": b1, "w2": w2, "b2": b2, "w4": w4, "b4": b4,
            "w7": w7, "b7": b7, "w8": w8, "b8": b8}


def pack_dqn_params(raw, neighbors_num, task_em_size, device_num):
    """Pack the 5 linear layers into 3 fused bf16 weights + 3 f32 bias rows."""
    d_e = neighbors_num * 3 + 3
    te = task_em_size
    h2 = te * 3
    de_in = d_e * device_num
    dk_in = te * device_num
    n_out = neighbors_num + 1
    f32, bf16 = jnp.float32, jnp.bfloat16
    assert d_e + te <= LANES and 128 + h2 <= 256 and n_out <= LANES

    # fc7 | fc8: shared output lanes [0,d_e) and [d_e,d_e+te)
    w7p = jnp.zeros((de_in, LANES), f32).at[:, :d_e].set(raw["w7"]).astype(bf16)
    w8p = jnp.zeros((dk_in, LANES), f32).at[:, d_e:d_e + te].set(raw["w8"]).astype(bf16)
    bA = (jnp.zeros((1, LANES), f32)
          .at[0, :d_e].set(raw["b7"]).at[0, d_e:d_e + te].set(raw["b8"]))

    # fc1 | fc2 fused to one (128, 256) weight: x -> lanes [0,128), y -> [128,128+h2)
    wB = jnp.zeros((LANES, 256), f32)
    wB = wB.at[:d_e, :128].set(raw["w1"])
    wB = wB.at[d_e:d_e + te, 128:128 + h2].set(raw["w2"])
    wB = wB.astype(bf16)
    bB = (jnp.zeros((1, 256), f32)
          .at[0, :128].set(raw["b1"]).at[0, 128:128 + h2].set(raw["b2"]))

    # fc4 fused over K = 256 ([x | y]); softmax lane mask baked into the bias.
    wC = jnp.zeros((256, LANES), f32)
    wC = wC.at[:128, :n_out].set(raw["w4"][:128, :])
    wC = wC.at[128:128 + h2, :n_out].set(raw["w4"][128:, :])
    wC = wC.astype(bf16)
    bC = jnp.full((1, LANES), -1e30, f32).at[0, :n_out].set(raw["b4"])

    return {"w7": w7p, "w8": w8p, "wB": wB, "wC": wC,
            "bA": bA, "bB": bB, "bC": bC}


# ------------------------------- references -------------------------------

def dqn_reference_f32(e_flat, k_flat, p):
    """Pure-f32 reference mirroring the PyTorch forward (per batch row)."""
    hp = jax.lax.Precision.HIGHEST
    e = jnp.dot(e_flat, p["w7"], precision=hp) + p["b7"]
    k = jnp.dot(k_flat, p["w8"], precision=hp) + p["b8"]
    x = jax.nn.relu(jnp.dot(e, p["w1"], precision=hp) + p["b1"])
    y = jax.nn.relu(jnp.dot(k, p["w2"], precision=hp) + p["b2"])
    logits = jnp.dot(jnp.concatenate([x, y], -1), p["w4"], precision=hp) + p["b4"]
    return jax.nn.softmax(logits, axis=-1)


def dqn_reference_bf16(e_flat, k_flat, p):
    """Mirror of the kernel's numerics: bf16 operands, f32 accumulation."""
    hp = jax.lax.Precision.HIGHEST
    q = lambda a: a.astype(jnp.bfloat16).astype(jnp.float32)
    e = jnp.dot(q(e_flat), q(p["w7"]), precision=hp) + p["b7"]
    k = jnp.dot(q(k_flat), q(p["w8"]), precision=hp) + p["b8"]
    x = jax.nn.relu(jnp.dot(q(e), q(p["w1"]), precision=hp) + p["b1"])
    y = jax.nn.relu(jnp.dot(q(k), q(p["w2"]), precision=hp) + p["b2"])
    logits = (jnp.dot(q(jnp.concatenate([x, y], -1)), q(p["w4"]), precision=hp)
              + p["b4"])
    return jax.nn.softmax(logits, axis=-1)


# ----------------------------------- main ----------------------------------

if __name__ == "__main__":
    # Small, self-consistent hyperparameters (the "args" of the module).
    neighbors_num = 4
    task_em_size = 8
    device_num = 2
    d_e = neighbors_num * 3 + 3          # 15
    n_out = neighbors_num + 1            # 5
    batch = 256                          # batched env steps -> 2 tiles of 128

    key = jax.random.PRNGKey(0)
    k_params, k_e, k_k = jax.random.split(key, 3)

    raw = init_dqn_params(k_params, neighbors_num, task_em_size, device_num)
    packed = pack_dqn_params(raw, neighbors_num, task_em_size, device_num)

    # o = [(e_i, k_i) per device]; stack + reshape(-1) is host-side glue, batched.
    e_stack = jax.random.normal(k_e, (batch, device_num, d_e), jnp.float32)
    k_stack = jax.random.normal(k_k, (batch, device_num, task_em_size), jnp.float32)
    e_flat = e_stack.reshape(batch, -1)  # (B, (3N+3)*device_num) = (256, 30)
    k_flat = k_stack.reshape(batch, -1)  # (B, task_em_size*device_num) = (256, 16)

    out = dqn_forward(e_flat, k_flat, packed, n_out)
    out = jax.block_until_ready(out)
    assert out.shape == (batch, n_out)

    # Tight structural check vs. a reference with identical bf16/f32 numerics.
    ref_q = dqn_reference_bf16(e_flat, k_flat, raw)
    assert jnp.allclose(out, ref_q, atol=2e-3, rtol=2e-3), \
        float(jnp.max(jnp.abs(out - ref_q)))
    # Loose check vs. the plain f32 module forward (bf16 operand quantization).
    ref = dqn_reference_f32(e_flat, k_flat, raw)
    assert jnp.allclose(out, ref, atol=3e-2, rtol=3e-2), \
        float(jnp.max(jnp.abs(out - ref)))
    # Exact softmax divide -> rows sum to 1 within f32 rounding.
    assert jnp.allclose(jnp.sum(out, axis=-1), 1.0, atol=1e-4)

    print("KERNEL_OK")
</pallas_src>

<mosaic_0001>
module attributes {stable_mosaic.version = 11 : i64} {
  func.func @dqn_kernel(%arg0: i32, %arg1: memref<128x30xf32, #tpu.memory_space<vmem>>, %arg2: memref<128x16xf32, #tpu.memory_space<vmem>>, %arg3: memref<30x128xbf16, #tpu.memory_space<vmem>>, %arg4: memref<16x128xbf16, #tpu.memory_space<vmem>>, %arg5: memref<128x256xbf16, #tpu.memory_space<vmem>>, %arg6: memref<256x128xbf16, #tpu.memory_space<vmem>>, %arg7: memref<1x128xf32, #tpu.memory_space<vmem>>, %arg8: memref<1x256xf32, #tpu.memory_space<vmem>>, %arg9: memref<1x128xf32, #tpu.memory_space<vmem>>, %arg10: memref<128x128xf32, #tpu.memory_space<vmem>>) attributes {dimension_semantics = [#tpu.dimension_semantics<parallel>], iteration_bounds = array<i64: 2>, scalar_prefetch = 0 : i64, scratch_operands = 0 : i64, tpu.core_type = #tpu.core_type<tc>, window_params = [{transform_indices = @transform_0, window_bounds = array<i64: 128, 30>}, {transform_indices = @transform_1, window_bounds = array<i64: 128, 16>}, {pipeline_mode = #tpu.pipeline_mode<synchronous>, transform_indices = @transform_2, window_bounds = array<i64: 30, 128>}, {pipeline_mode = #tpu.pipeline_mode<synchronous>, transform_indices = @transform_3, window_bounds = array<i64: 16, 128>}, {pipeline_mode = #tpu.pipeline_mode<synchronous>, transform_indices = @transform_4, window_bounds = array<i64: 128, 256>}, {pipeline_mode = #tpu.pipeline_mode<synchronous>, transform_indices = @transform_5, window_bounds = array<i64: 256, 128>}, {pipeline_mode = #tpu.pipeline_mode<synchronous>, transform_indices = @transform_6, window_bounds = array<i64: 1, 128>}, {pipeline_mode = #tpu.pipeline_mode<synchronous>, transform_indices = @transform_7, window_bounds = array<i64: 1, 256>}, {pipeline_mode = #tpu.pipeline_mode<synchronous>, transform_indices = @transform_8, window_bounds = array<i64: 1, 128>}, {transform_indices = @transform_9, window_bounds = array<i64: 128, 128>}]} {
    %c0 = arith.constant 0 : index
    %c0_0 = arith.constant 0 : index
    %0 = vector.load %arg1[%c0, %c0_0] : memref<128x30xf32, #tpu.memory_space<vmem>>, vector<128x30xf32>
    %1 = arith.truncf %0 : vector<128x30xf32> to vector<128x30xbf16>
    %c0_1 = arith.constant 0 : index
    %c0_2 = arith.constant 0 : index
    %2 = vector.load %arg2[%c0_1, %c0_2] : memref<128x16xf32, #tpu.memory_space<vmem>>, vector<128x16xf32>
    %3 = arith.truncf %2 : vector<128x16xf32> to vector<128x16xbf16>
    %c0_3 = arith.constant 0 : index
    %c0_4 = arith.constant 0 : index
    %4 = vector.load %arg3[%c0_3, %c0_4] : memref<30x128xbf16, #tpu.memory_space<vmem>>, vector<30x128xbf16>
    %cst = arith.constant dense<0.000000e+00> : vector<128x128xf32>
    %5 = tpu.matmul %1, %4, %cst {dimension_numbers = #tpu.dot_dimension_numbers<[1], [0], [0], [1], [0, 0, 1, 1], [], []>} : vector<128x30xbf16>, vector<30x128xbf16>, vector<128x128xf32> -> vector<128x128xf32>
    %c0_5 = arith.constant 0 : index
    %c0_6 = arith.constant 0 : index
    %6 = vector.load %arg4[%c0_5, %c0_6] : memref<16x128xbf16, #tpu.memory_space<vmem>>, vector<16x128xbf16>
    %cst_7 = arith.constant dense<0.000000e+00> : vector<128x128xf32>
    %7 = tpu.matmul %3, %6, %cst_7 {dimension_numbers = #tpu.dot_dimension_numbers<[1], [0], [0], [1], [0, 0, 1, 1], [], []>} : vector<128x16xbf16>, vector<16x128xbf16>, vector<128x128xf32> -> vector<128x128xf32>
    %8 = arith.addf %5, %7 : vector<128x128xf32>
    %c0_8 = arith.constant 0 : index
    %c0_9 = arith.constant 0 : index
    %9 = vector.load %arg7[%c0_8, %c0_9] : memref<1x128xf32, #tpu.memory_space<vmem>>, vector<1x128xf32>
    %10 = vector.broadcast %9 : vector<1x128xf32> to vector<128x128xf32>
    %11 = arith.addf %8, %10 : vector<128x128xf32>
    %12 = arith.truncf %11 : vector<128x128xf32> to vector<128x128xbf16>
    %c0_10 = arith.constant 0 : index
    %c0_11 = arith.constant 0 : index
    %13 = vector.load %arg5[%c0_10, %c0_11] : memref<128x256xbf16, #tpu.memory_space<vmem>>, vector<128x256xbf16>
    %cst_12 = arith.constant dense<0.000000e+00> : vector<128x256xf32>
    %14 = tpu.matmul %12, %13, %cst_12 {dimension_numbers = #tpu.dot_dimension_numbers<[1], [0], [0], [1], [0, 0, 1, 1], [], []>} : vector<128x128xbf16>, vector<128x256xbf16>, vector<128x256xf32> -> vector<128x256xf32>
    %c0_13 = arith.constant 0 : index
    %c0_14 = arith.constant 0 : index
    %15 = vector.load %arg8[%c0_13, %c0_14] : memref<1x256xf32, #tpu.memory_space<vmem>>, vector<1x256xf32>
    %16 = vector.broadcast %15 : vector<1x256xf32> to vector<128x256xf32>
    %17 = arith.addf %14, %16 : vector<128x256xf32>
    %cst_15 = arith.constant 0.000000e+00 : f32
    %18 = vector.broadcast %cst_15 : f32 to vector<128x256xf32>
    %19 = arith.maximumf %17, %18 : vector<128x256xf32>
    %20 = arith.truncf %19 : vector<128x256xf32> to vector<128x256xbf16>
    %c0_16 = arith.constant 0 : index
    %c0_17 = arith.constant 0 : index
    %21 = vector.load %arg6[%c0_16, %c0_17] : memref<256x128xbf16, #tpu.memory_space<vmem>>, vector<256x128xbf16>
    %cst_18 = arith.constant dense<0.000000e+00> : vector<128x128xf32>
    %22 = tpu.matmul %20, %21, %cst_18 {dimension_numbers = #tpu.dot_dimension_numbers<[1], [0], [0], [1], [0, 0, 1, 1], [], []>} : vector<128x256xbf16>, vector<256x128xbf16>, vector<128x128xf32> -> vector<128x128xf32>
    %c0_19 = arith.constant 0 : index
    %c0_20 = arith.constant 0 : index
    %23 = vector.load %arg9[%c0_19, %c0_20] : memref<1x128xf32, #tpu.memory_space<vmem>>, vector<1x128xf32>
    %24 = vector.broadcast %23 : vector<1x128xf32> to vector<128x128xf32>
    %25 = arith.addf %22, %24 : vector<128x128xf32>
    %cst_21 = arith.constant dense<0xFF800000> : vector<128xf32>
    %26 = vector.multi_reduction <maximumf>, %25, %cst_21 [1] : vector<128x128xf32> to vector<128xf32>
    %27 = vector.shape_cast %26 : vector<128xf32> to vector<128x1xf32>
    %28 = vector.broadcast %27 : vector<128x1xf32> to vector<128x128xf32>
    %29 = arith.subf %25, %28 : vector<128x128xf32>
    %30 = math.exp %29 : vector<128x128xf32>
    %cst_22 = arith.constant dense<0.000000e+00> : vector<128xf32>
    %31 = vector.multi_reduction <add>, %30, %cst_22 [1] : vector<128x128xf32> to vector<128xf32>
    %32 = vector.shape_cast %31 : vector<128xf32> to vector<128x1xf32>
    %33 = vector.broadcast %32 : vector<128x1xf32> to vector<128x128xf32>
    %34 = arith.divf %30, %33 : vector<128x128xf32>
    %c0_23 = arith.constant 0 : index
    %c0_24 = arith.constant 0 : index
    %35 = vector.load %arg10[%c0_23, %c0_24] : memref<128x128xf32, #tpu.memory_space<vmem>>, vector<128x128xf32>
    tpu.vector_store %arg10[%c0_23, %c0_24], %34 {strides = array<i32>} : memref<128x128xf32, #tpu.memory_space<vmem>>, vector<128x128xf32>,
    return
  }
  func.func @transform_0(%arg0: i32) -> (i32, i32) {
    %c0_i32 = arith.constant 0 : i32
    %c0_i32_0 = arith.constant 0 : i32
    return %arg0, %c0_i32 : i32, i32
  }
  func.func @transform_1(%arg0: i32) -> (i32, i32) {
    %c0_i32 = arith.constant 0 : i32
    %c0_i32_0 = arith.constant 0 : i32
    return %arg0, %c0_i32 : i32, i32
  }
  func.func @transform_2(%arg0: i32) -> (i32, i32) {
    %c0_i32 = arith.constant 0 : i32
    %c0_i32_0 = arith.constant 0 : i32
    %c0_i32_1 = arith.constant 0 : i32
    return %c0_i32, %c0_i32_0 : i32, i32
  }
  func.func @transform_3(%arg0: i32) -> (i32, i32) {
    %c0_i32 = arith.constant 0 : i32
    %c0_i32_0 = arith.constant 0 : i32
    %c0_i32_1 = arith.constant 0 : i32
    return %c0_i32, %c0_i32_0 : i32, i32
  }
  func.func @transform_4(%arg0: i32) -> (i32, i32) {
    %c0_i32 = arith.constant 0 : i32
    %c0_i32_0 = arith.constant 0 : i32
    %c0_i32_1 = arith.constant 0 : i32
    return %c0_i32, %c0_i32_0 : i32, i32
  }
  func.func @transform_5(%arg0: i32) -> (i32, i32) {
    %c0_i32 = arith.constant 0 : i32
    %c0_i32_0 = arith.constant 0 : i32
    %c0_i32_1 = arith.constant 0 : i32
    return %c0_i32, %c0_i32_0 : i32, i32
  }
  func.func @transform_6(%arg0: i32) -> (i32, i32) {
    %c0_i32 = arith.constant 0 : i32
    %c0_i32_0 = arith.constant 0 : i32
    %c0_i32_1 = arith.constant 0 : i32
    return %c0_i32, %c0_i32_0 : i32, i32
  }
  func.func @transform_7(%arg0: i32) -> (i32, i32) {
    %c0_i32 = arith.constant 0 : i32
    %c0_i32_0 = arith.constant 0 : i32
    %c0_i32_1 = arith.constant 0 : i32
    return %c0_i32, %c0_i32_0 : i32, i32
  }
  func.func @transform_8(%arg0: i32) -> (i32, i32) {
    %c0_i32 = arith.constant 0 : i32
    %c0_i32_0 = arith.constant 0 : i32
    %c0_i32_1 = arith.constant 0 : i32
    return %c0_i32, %c0_i32_0 : i32, i32
  }
  func.func @transform_9(%arg0: i32) -> (i32, i32) {
    %c0_i32 = arith.constant 0 : i32
    %c0_i32_0 = arith.constant 0 : i32
    return %arg0, %c0_i32 : i32, i32
  }
}

</mosaic_0001>

<bundles_post_ra>
// kernel: tpu_custom_call.1
= control target key start
LH: loop header
LB: loop body
LE: loop exit
PB: predicated region body
PF: predicated region fallthrough
CT: control target
= control target key end

     0   :  { %14 = vsyncpa [#allocation3], 0  ;;  %s2431_s0 = inlined_call_operand.vmem [shape: f32[256,30], index: 0, kind: input, shape index: {}]   ;;  %s2432_s1 = inlined_call_operand.vmem [shape: f32[256,16], index: 1, kind: input, shape index: {}]   ;;  %s2433_s2 = inlined_call_operand.vmem [shape: bf16[30,128], index: 2, kind: input, shape index: {}]   ;;  %s2434_s3 = inlined_call_operand.vmem [shape: bf16[16,128], index: 3, kind: input, shape index: {}]   ;;  %s2435_s4 = inlined_call_operand.vmem [shape: bf16[128,256], index: 4, kind: input, shape index: {}]   ;;  %s2436_s5 = inlined_call_operand.vmem [shape: bf16[256,128], index: 5, kind: input, shape index: {}]   ;;  %s2437_s6 = inlined_call_operand.vmem [shape: f32[1,128], index: 6, kind: input, shape index: {}]   ;;  %s2438_s7 = inlined_call_operand.vmem [shape: f32[1,256], index: 7, kind: input, shape index: {}]   ;;  %s2439_s8 = inlined_call_operand.vmem [shape: f32[1,128], index: 8, kind: input, shape index: {}]   ;;  %s2440_s9 = inlined_call_operand.hbm [shape: f32[256,128], index: 9, kind: output, shape index: {}]  }
   0x1   :  { %16 = vsyncpa [#allocation3 + $0x1], 0  ;;  %s1929_s30 = smov 0   ;;  %s1931_s10 = smov 0  }
   0x2   :  { %s1933_s11 = smov 0   ;;  %s1935_s12 = smov 0  }
   0x3 LB: > { %s1950_s13 = sadd.s32 4294967295, %s1873_s12   ;;  %s1456_s14 = sadd.s32 4294967294, %s1873_s12   ;;  %s1873_s12 = sphi %s1935_s12, %s2446_s12   ;;  %s1869_s11 = sphi %s1933_s11, %s2445_s11   ;;  %s1865_s10 = sphi %s1931_s10, %s2444_s10   ;;  %s1861_s30 = sphi %s1929_s30, %s2443_s30  }
   0x4   : > { %s1954_s15 = sadd.s32 1, %s1873_s12   ;;  %s228_s16 = sadd.s32 1, %s1869_s11 }
   0x5   : > { %s225_s17 = ssub.s32 %s1873_s12, %s1954_s15  ;;  %p238_p0 = scmp.ne.s32.totalorder %s1869_s11, %s1865_s10 }
   0x6   : > { %p226_p1 = scmp.eq.s32.totalorder %s225_s17, 0  ;;  %p239_p2 = scmp.eq.s32.totalorder %s1950_s13, 1 }
   0x7   : > { %p244_p3 = scmp.ne.s32.totalorder %s1865_s10, %s1861_s30  ;;  %p245_p4 = scmp.eq.s32.totalorder %s1456_s14, 1 }
   0x8   : > { %s1965_s18 = scalar_select %p226_p1, %s1869_s11, %s228_s16  }
   0x9   : > { %p1967_p5 = por %p239_p2, %p238_p0  ;;  %p1971_p6 = por %p245_p4, %p244_p3 }
   0xa   : > { %p1459_p7 = scmp.ge.s32.totalorder %s1873_s12, 1  ;;  %p302_p8 = scmp.lt.s32.totalorder %s1873_s12, 3 }
   0xc   : > { %p303_p9 = pnand %p1459_p7, %p302_p8 }
   0xd   : > { %v1704_v0 = vld [vmem:[%s2433_s2] sm:$0xff] (!%p303_p9)   ;;  %vm575_vm0 = vcmask (!%p303_p9), 1046528   ;;  %s1461_s25 = sshll.u32 (!%p303_p9), %s1950_s13, 4  ;;  %v1706_v2 = vld [vmem:[%s2433_s2 + $0x8] sm:$0x7f] (!%p303_p9)   ;;  %vm417_vm1 = vcmask (!%p303_p9), 130048  }
   0xe   : > { %306 = sbr.rel (%p303_p9) target bundleno = 1074 (0x432), region = 56  ;;  %v1705_v1 = vld [vmem:[%s2434_s3] sm:$0xff] (!%p303_p9)   ;;  %1625 = vmatprep.subr.bf16.mxu0 (!%p303_p9), %v1704_v0  ;;  %p344_p10 = scmp.lt.s32.totalorder (!%p303_p9), %s1461_s25, 31  ;;  %v577_v3 = vsel (!%p303_p9), %vm575_vm0, %v1706_v2, 0  ;;  %vm550_vm2 = vcmask (!%p303_p9), 244736  }
   0xf   : > { %1626 = vmatpush3.bf16.msra.mxu0 (!%p303_p9), %v1704_v0  ;;  %1607 = vmatprep.subr.bf16.mxu1 (!%p303_p9), %v1705_v1  ;;  %v1709_v4 = vld [vmem:[%s2435_s4 + $0x4] ss:$8 sps:$4 sm:$0xff] (!%p303_p9)   ;;  %v1707_v5 = vld [vmem:[%s2435_s4] ss:$8 sps:$4 sm:$0xff] (!%p303_p9)   ;;  %v1712_v13 = vld [vmem:[%s2435_s4 + $0x14] ss:$8 sps:$4 sm:$0xff] (!%p303_p9)  }
  0x10   : > { %1661 = vmatprep.subr.msk.bf16.mxu0 (!%p303_p9), %vm575_vm0, %v1706_v2  ;;  %1608 = vmatpush3.bf16.msra.mxu1 (!%p303_p9), %v1705_v1  ;;  %v1710_v25 = vld [vmem:[%s2435_s4 + $0x10] ss:$8 sps:$4 sm:$0xff] (!%p303_p9)   ;;  %v1715_v26 = vld [vmem:[%s2435_s4 + $0x24] ss:$8 sps:$4 sm:$0xff] (!%p303_p9)   ;;  %v1713_v39 = vld [vmem:[%s2435_s4 + $0x20] ss:$8 sps:$4 sm:$0xff] (!%p303_p9)  }
  0x11   : > { %815 = vmatprep.subr.bf16.mxu1 (!%p303_p9), %v1709_v4  ;;  %v1718_v40 = vld [vmem:[%s2435_s4 + $0x34] ss:$8 sps:$4 sm:$0xff] (!%p303_p9)   ;;  %v1716_v47 = vld [vmem:[%s2435_s4 + $0x30] ss:$8 sps:$4 sm:$0xff] (!%p303_p9)   ;;  %v1721_v50 = vld [vmem:[%s2435_s4 + $0x44] ss:$8 sps:$4 sm:$0xff] (!%p303_p9)  }
  0x12   : > { %v1719_v52 = vld [vmem:[%s2435_s4 + $0x40] ss:$8 sps:$4 sm:$0xff] (!%p303_p9)   ;;  %v1724_v55 = vld [vmem:[%s2435_s4 + $0x54] ss:$8 sps:$4 sm:$0xff] (!%p303_p9)   ;;  %v1722_v61 = vld [vmem:[%s2435_s4 + $0x50] ss:$8 sps:$4 sm:$0xff] (!%p303_p9)  }
  0x13   : > { %1628 = vmatpush3.bf16.msra.mxu0 (!%p303_p9), %v577_v3  ;;  %v1727_v0 = vld [vmem:[%s2435_s4 + $0x64] ss:$8 sps:$4 sm:$0xff] (!%p303_p9)   ;;  %v1725_v1 = vld [vmem:[%s2435_s4 + $0x60] ss:$8 sps:$4 sm:$0xff] (!%p303_p9)   ;;  %v1730_v2 = vld [vmem:[%s2435_s4 + $0x74] ss:$8 sps:$4 sm:$0xff] (!%p303_p9)  }
  0x14   : > { %v1728_v3 = vld [vmem:[%s2435_s4 + $0x70] ss:$8 sps:$4 sm:$0xff] (!%p303_p9)   ;;  %v1875_v4 = vmov (!%p303_p9), 0   ;;  %s340_s26 = sand.u32 (!%p303_p9), 1, %s1865_s10   ;;  %s1876_s17 = smov (!%p303_p9), [#allocation2]  }
  0x15   : > { %s2448_s25 = smov (!%p344_p10, %s1461_s25), 31  ;;  %s1460_s27 = sshll.u32 %s340_s26, 7 }
  0x16   : > { %s1462_s14 = sshll.u32 %s2448_s25, 3  ;;  %s1815_s22 = sshll.u32 %s1876_s17, 4  ;;  %s1816_s22 = int_to_ptr.vmem [resolvable:$false] %s1815_s22 }
  0x17   : > { %s1993_s21 = scalar_lea.vmem %s2432_s1, %s1462_s14  ;;  %s1998_s24 = scalar_lea.vmem %s2431_s0, %s1462_s14 }
  0x18   : > { %v381_v6 = vld [vmem:[%s1993_s21] sm:$0xff]  ;;  %v382_v7 = vld [vmem:[%s1993_s21 + $0x8] sm:$0xff]  ;;  %v383_v11 = vld [vmem:[%s1993_s21 + $0x10] sm:$0xff]  ;;  %s1817_s23 = scalar_lea.vmem %s1816_s22, 4096 }
  0x19   : > { %v357_v8 = vld [vmem:[%s1998_s24] sm:$0xff]  ;;  %v397_v9 = vpack.c.bf16 %v382_v7, %v381_v6  ;;  %v358_v10 = vld [vmem:[%s1998_s24 + $0x8] sm:$0xff]  ;;  %v384_v12 = vld [vmem:[%s1993_s21 + $0x18] sm:$0xff] }
  0x1a   : > { %v373_v14 = vpack.c.bf16 %v358_v10, %v357_v8  ;;  %v398_v15 = vpack.c.bf16 %v384_v12, %v383_v11  ;;  %v359_v16 = vld [vmem:[%s1998_s24 + $0x10] sm:$0xff]  ;;  %v360_v17 = vld [vmem:[%s1998_s24 + $0x18] sm:$0xff]  ;;  %v385_v18 = vld [vmem:[%s1993_s21 + $0x20] sm:$0xff] }
  0x1b   : > { %1609 = vmatprep.mubr.msk.bf16.mxu1 %vm417_vm1, %v397_v9  ;;  %v374_v19 = vpack.c.bf16 %v360_v17, %v359_v16  ;;  %v386_v20 = vld [vmem:[%s1993_s21 + $0x28] sm:$0xff]  ;;  %v361_v21 = vld [vmem:[%s1998_s24 + $0x20] sm:$0xff]  ;;  %v387_v27 = vld [vmem:[%s1993_s21 + $0x30] sm:$0xff] }
  0x1c   : > { %v362_v22 = vld [vmem:[%s1998_s24 + $0x28] sm:$0xff]  ;;  %1629 = vmatprep.mubr.msk.bf16.mxu0 %vm550_vm2, %v373_v14  ;;  %1610 = vmatmul.mubr.msk.bf16.vlgmr.msra.gmra.mrb[0].mxu1 %vm417_vm1, %v398_v15  ;;  %v399_v23 = vpack.c.bf16 %v386_v20, %v385_v18  ;;  %v388_v28 = vld [vmem:[%s1993_s21 + $0x38] sm:$0xff]  ;;  %v363_v29 = vld [vmem:[%s1998_s24 + $0x30] sm:$0xff] }
  0x1d   : > { %v375_v24 = vpack.c.bf16 %v362_v22, %v361_v21  ;;  %1630 = vmatmul.mubr.msk.bf16.vlgmr.msra.gmra.mrb[0].mxu0 %vm550_vm2, %v374_v19  ;;  %816 = vmatpush1.bf16.msra.mxu1 %v1707_v5  ;;  %v364_v30 = vld [vmem:[%s1998_s24 + $0x38] sm:$0xff]  ;;  %v389_v31 = vld [vmem:[%s1993_s21 + $0x40] sm:$0xff]  ;;  %v390_v32 = vld [vmem:[%s1993_s21 + $0x48] sm:$0xff]  ;;  %v400_v35 = vpack.c.bf16 %v388_v28, %v387_v27 }
  0x1e   : > { %1613 = vmatprep.mubr.msk.bf16.mxu1 %vm417_vm1, %v399_v23  ;;  %v365_v33 = vld [vmem:[%s1998_s24 + $0x40] sm:$0xff]  ;;  %v366_v34 = vld [vmem:[%s1998_s24 + $0x48] sm:$0xff]  ;;  %817 = vmatprep.subr.bf16.mxu1 %v1712_v13  ;;  %v376_v36 = vpack.c.bf16 %v364_v30, %v363_v29  ;;  %v401_v37 = vpack.c.bf16 %v390_v32, %v389_v31  ;;  %v391_v41 = vld [vmem:[%s1993_s21 + $0x50] sm:$0xff] }
  0x1f   : > { %1633 = vmatprep.mubr.msk.bf16.mxu0 %vm550_vm2, %v375_v24  ;;  %v377_v38 = vpack.c.bf16 %v366_v34, %v365_v33  ;;  %v392_v42 = vld [vmem:[%s1993_s21 + $0x58] sm:$0xff]  ;;  %v367_v43 = vld [vmem:[%s1998_s24 + $0x50] sm:$0xff]  ;;  %v393_v45 = vld [vmem:[%s1993_s21 + $0x60] sm:$0xff] }
  0x20   : > { %v368_v44 = vld [vmem:[%s1998_s24 + $0x58] sm:$0xff]  ;;  %v394_v46 = vld [vmem:[%s1993_s21 + $0x68] sm:$0xff]  ;;  %v369_v48 = vld [vmem:[%s1998_s24 + $0x60] sm:$0xff]  ;;  %v402_v51 = vpack.c.bf16 %v392_v42, %v391_v41 }
  0x21   : > { %818 = vmatpush1.bf16.msra.mxu1 %v1710_v25  ;;  %v370_v49 = vld [vmem:[%s1998_s24 + $0x68] sm:$0xff]  ;;  %v378_v53 = vpack.c.bf16 %v368_v44, %v367_v43  ;;  %v403_v54 = vpack.c.bf16 %v394_v46, %v393_v45  ;;  %v395_v57 = vld [vmem:[%s1993_s21 + $0x70] sm:$0xff]  ;;  %v396_v58 = vld [vmem:[%s1993_s21 + $0x78] sm:$0xff]  ;;  %s2346_s21 = scalar_lea.vmem [#allocation2], %s1460_s27 }
  0x22   : > { %819 = vmatprep.subr.bf16.mxu1 %v1715_v26  ;;  %v379_v56 = vpack.c.bf16 %v370_v49, %v369_v48  ;;  %v371_v59 = vld [vmem:[%s1998_s24 + $0x70] sm:$0xff]  ;;  %v372_v60 = vld [vmem:[%s1998_s24 + $0x78] sm:$0xff]  ;;  %v404_v62 = vpack.c.bf16 %v396_v58, %v395_v57  ;;  %v1731_v5 = vld [vmem:[%s2436_s5 + $0x40] sm:$0xff]   ;;  %s1523_s24 = sshll.u32 %s1950_s13, 11  ;;  %s1382_s25 = sshll.u32 %s2346_s21, 4  ;;  %s2383_s25 = int_to_ptr.vmem [resolvable:$true] %s1382_s25 }
  0x23   : > { %v380_v63 = vpack.c.bf16 %v372_v60, %v371_v59  ;;  %v1732_v6 = vld [vmem:[%s2436_s5] sm:$0xff]   ;;  %v1733_v7 = vld [vmem:[%s2436_s5 + $0x48] sm:$0xff]   ;;  %1543 = vmatprep.subr.bf16.mxu0 %v1731_v5  ;;  %v1735_v9 = vld [vmem:[%s2436_s5 + $0x50] sm:$0xff]   ;;  %s2381_s14 = scalar_lea.hbm %s2440_s9, %s1523_s24  ;;  %s2390_s13 = scalar_lea.sflag [#allocation3], %s340_s26 }
  0x24   : > { %1614 = vmatmul.mubr.msk.bf16.gmra.mrb[4].mxu1 %vm417_vm1, %v400_v35  ;;  %1544 = vmatpush3.bf16.msra.mxu0 %v1732_v6  ;;  %v1734_v8 = vld [vmem:[%s2436_s5 + $0x8] sm:$0xff]   ;;  %v1736_v10 = vld [vmem:[%s2436_s5 + $0x10] sm:$0xff]   ;;  %v1737_v11 = vld [vmem:[%s2436_s5 + $0x58] sm:$0xff]   ;;  %s1811_s16 = scalar_lea.vmem %s2383_s25, 2048  ;;  %p1818_p0 = scmp.lt.s32.totalorder %s2383_s25, %s1816_s22 }
  0x25   : > { %1634 = vmatmul.mubr.msk.bf16.gmra.mrb[4].mxu0 %vm550_vm2, %v376_v36  ;;  %1617 = vmatprep.mubr.msk.bf16.mxu1 %vm417_vm1, %v401_v37  ;;  %v1738_v12 = vld [vmem:[%s2436_s5 + $0x18] sm:$0xff]   ;;  %v1739_v13 = vld [vmem:[%s2436_s5 + $0x60] sm:$0xff]   ;;  %v1741_v15 = vld [vmem:[%s2436_s5 + $0x68] sm:$0xff]   ;;  %p1812_p11 = scmp.ne.s32.totalorder %s2383_s25, %s1811_s16  ;;  %p1819_p1 = scmp.lt.s32.totalorder %s1817_s23, %s1811_s16 }
  0x26   : > { %1637 = vmatprep.mubr.msk.bf16.mxu0 %vm550_vm2, %v377_v38  ;;  %820 = vmatpush1.bf16.msra.mxu1 %v1713_v39  ;;  %v1740_v14 = vld [vmem:[%s2436_s5 + $0x20] sm:$0xff]   ;;  %v1742_v16 = vld [vmem:[%s2436_s5 + $0x28] sm:$0xff]  }
  0x27   : > { %821 = vmatprep.subr.bf16.mxu1 %v1718_v40  ;;  %1545 = vmatprep.subr.bf16.mxu0 %v1733_v7  ;;  %v2133_v23 = vld [vmem:[%s2437_s6] ss:$0 sm:$0xff]  ;;  %p1813_p12 = pnand %p1812_p11, %p1967_p5  ;;  %p1820_p2 = por %p1819_p1, %p1818_p0 }
  0x28   : > { %1546 = vmatpush3.bf16.msra.mxu0 %v1734_v8 }
  0x29   : > { %1547 = vmatprep.subr.bf16.mxu0 %v1735_v9  ;;  %p1814_p13 = pneg %p1813_p12 }
  0x2a   : > { %822 = vmatpush1.bf16.msra.mxu1 %v1716_v47 }
  0x2b   : > { %823 = vmatprep.subr.bf16.mxu1 %v1721_v50  ;;  %p1821_p3 = pnand %p1820_p2, %p1814_p13 }
  0x2c   : > { %1618 = vmatmul.mubr.msk.bf16.gmra.mrb[8].mxu1 %vm417_vm1, %v402_v51  ;;  %1548 = vmatpush3.bf16.msra.mxu0 %v1736_v10 }
  0x2d   : > { %1638 = vmatmul.mubr.msk.bf16.gmra.mrb[8].mxu0 %vm550_vm2, %v378_v53  ;;  %1621 = vmatprep.mubr.msk.bf16.mxu1 %vm417_vm1, %v403_v54 }
  0x2e   : > { %1641 = vmatprep.mubr.msk.bf16.mxu0 %vm550_vm2, %v379_v56  ;;  %824 = vmatpush1.bf16.msra.mxu1 %v1719_v52 }
  0x2f   : > { %825 = vmatprep.subr.bf16.mxu1 %v1724_v55  ;;  %1549 = vmatprep.subr.bf16.mxu0 %v1737_v11 }
  0x30   : > { %1550 = vmatpush3.bf16.msra.mxu0 %v1738_v12 }
  0x31   : > { %1551 = vmatprep.subr.bf16.mxu0 %v1739_v13 }
  0x32   : > { %826 = vmatpush1.bf16.msra.mxu1 %v1722_v61 }
  0x33   : > { %827 = vmatprep.subr.bf16.mxu1 %v1727_v0 }
  0x34   : > { %1622 = vmatmul.mubr.msk.bf16.gmra.mrb[12].mxu1 %vm417_vm1, %v404_v62  ;;  %1552 = vmatpush3.bf16.msra.mxu0 %v1740_v14 }
  0x35   : > { %1642 = vmatmul.mubr.msk.bf16.gmra.mrb[12].mxu0 %vm550_vm2, %v380_v63  ;;  %847 = vmatprep.mubr.bf16.mxu1 %v1875_v4 }
  0x36   : > { %828 = vmatpush1.bf16.msra.mxu1 %v1725_v1  ;;  %1553 = vmatprep.subr.bf16.mxu0 %v1741_v15 }
  0x37   : > { %829 = vmatprep.subr.bf16.mxu1 %v1730_v2 }
  0x38   : > { %1554 = vmatpush3.bf16.msra.mxu0 %v1742_v16 }
  0x3a   : > { %830 = vmatpush1.bf16.msra.mxu1 %v1728_v3 }
  0xef   : > { %v1611_v17 = vpop.f32.mrb[0].mxu1 }
  0xf0   : > { %v1631_v18 = vpop.f32.mrb[0].mxu0  ;;  %v476_v19 = vpop.f32.mrb[1].mxu1 }
  0xf1   : > { %v622_v20 = vadd.f32 %v1631_v18, %v1611_v17  ;;  %v613_v21 = vpop.f32.mrb[1].mxu0  ;;  %v1612_v22 = vpop.f32.mrb[2].mxu1 }
  0xf2   : > { %v614_v24 = vadd.f32 %v613_v21, %v476_v19  ;;  %v1632_v25 = vpop.f32.mrb[2].mxu0  ;;  %v479_v26 = vpop.f32.mrb[3].mxu1 }
  0xf3   : > { %v625_v27 = vadd.f32 %v1632_v25, %v1612_v22  ;;  %v616_v28 = vpop.f32.mrb[3].mxu0  ;;  %v685_v30 = vadd.f32 %v2133_v23, %v622_v20 }
  0xf4   : > { %v617_v29 = vadd.f32 %v616_v28, %v479_v26  ;;  %v683_v32 = vadd.f32 %v2133_v23, %v614_v24  ;;  %v1743_v28 = vld [vmem:[%s2436_s5 + $0x70] sm:$0xff]  }
  0xf5   : > { %v686_v31 = vadd.f32 %v2133_v23, %v625_v27  ;;  %1555 = vmatprep.subr.bf16.mxu0 %v1743_v28 }
  0xf6   : > { %v684_v33 = vadd.f32 %v2133_v23, %v617_v29  ;;  %v1745_v29 = vld [vmem:[%s2436_s5 + $0x78] sm:$0xff]  }
  0xf7   : > { %v1615_v34 = vpop.f32.mrb[4].mxu1  ;;  %v700_v35 = vpack.c.bf16 %v686_v31, %v685_v30  ;;  %v1746_v30 = vld [vmem:[%s2436_s5 + $0x38] sm:$0xff]  }
  0xf8   : > { %v699_v36 = vpack.c.bf16 %v684_v33, %v683_v32  ;;  %v1635_v37 = vpop.f32.mrb[4].mxu0  ;;  %v492_v38 = vpop.f32.mrb[5].mxu1  ;;  %v723_v33 = vld [vmem:[%s2438_s7] sm:$0x3] }
  0xf9   : > { %v638_v39 = vadd.f32 %v1635_v37, %v1615_v34  ;;  %v629_v40 = vpop.f32.mrb[5].mxu0  ;;  %v1616_v41 = vpop.f32.mrb[6].mxu1 }
  0xfa   : > { %848 = vmatmul.mubr.bf16.vlgmr.msra.gmra.mrb[16].mxu1 %v699_v36  ;;  %v630_v42 = vadd.f32 %v629_v40, %v492_v38  ;;  %v1636_v43 = vpop.f32.mrb[6].mxu0  ;;  %v495_v44 = vpop.f32.mrb[7].mxu1 }
  0xfb   : > { %v689_v45 = vadd.f32 %v2133_v23, %v638_v39  ;;  %v641_v46 = vadd.f32 %v1636_v43, %v1616_v41  ;;  %v632_v47 = vpop.f32.mrb[7].mxu0  ;;  %857 = vmatprep.mubr.bf16.mxu1 %v1875_v4 }
  0xfc   : > { %v687_v48 = vadd.f32 %v2133_v23, %v630_v42  ;;  %v633_v49 = vadd.f32 %v632_v47, %v495_v44 }
  0xfd   : > { %v690_v50 = vadd.f32 %v2133_v23, %v641_v46 }
  0xfe   : > { %v688_v51 = vadd.f32 %v2133_v23, %v633_v49 }
  0xff   : > { %v1619_v52 = vpop.f32.mrb[8].mxu1  ;;  %v702_v53 = vpack.c.bf16 %v690_v50, %v689_v45 }
 0x100   : > { %v701_v54 = vpack.c.bf16 %v688_v51, %v687_v48  ;;  %v1639_v55 = vpop.f32.mrb[8].mxu0  ;;  %v508_v56 = vpop.f32.mrb[9].mxu1 }
 0x101   : > { %v654_v57 = vadd.f32 %v1639_v55, %v1619_v52  ;;  %v645_v58 = vpop.f32.mrb[9].mxu0  ;;  %v1620_v59 = vpop.f32.mrb[10].mxu1 }
 0x102   : > { %858 = vmatmul.mubr.bf16.gmra.mrb[20].mxu1 %v700_v35  ;;  %v646_v60 = vadd.f32 %v645_v58, %v508_v56  ;;  %v1640_v61 = vpop.f32.mrb[10].mxu0  ;;  %v511_v62 = vpop.f32.mrb[11].mxu1 }
 0x103   : > { %867 = vmatprep.mubr.bf16.mxu1 %v1875_v4  ;;  %v693_v63 = vadd.f32 %v2133_v23, %v654_v57  ;;  %v657_v0 = vadd.f32 %v1640_v61, %v1620_v59  ;;  %v648_v1 = vpop.f32.mrb[11].mxu0 }
 0x104   : > { %v691_v2 = vadd.f32 %v2133_v23, %v646_v60  ;;  %v649_v3 = vadd.f32 %v648_v1, %v511_v62 }
 0x105   : > { %v694_v5 = vadd.f32 %v2133_v23, %v657_v0 }
 0x106   : > { %v692_v6 = vadd.f32 %v2133_v23, %v649_v3 }
 0x107   : > { %v1623_v7 = vpop.f32.mrb[12].mxu1  ;;  %v704_v8 = vpack.c.bf16 %v694_v5, %v693_v63 }
 0x108   : > { %v703_v9 = vpack.c.bf16 %v692_v6, %v691_v2  ;;  %v1643_v10 = vpop.f32.mrb[12].mxu0  ;;  %v524_v11 = vpop.f32.mrb[13].mxu1 }
 0x109   : > { %v670_v12 = vadd.f32 %v1643_v10, %v1623_v7  ;;  %v661_v13 = vpop.f32.mrb[13].mxu0  ;;  %v1624_v14 = vpop.f32.mrb[14].mxu1 }
 0x10a   : > { %868 = vmatmul.mubr.bf16.gmra.mrb[24].mxu1 %v701_v54  ;;  %v662_v15 = vadd.f32 %v661_v13, %v524_v11  ;;  %v1644_v16 = vpop.f32.mrb[14].mxu0  ;;  %v527_v17 = vpop.f32.mrb[15].mxu1 }
 0x10b   : > { %877 = vmatprep.mubr.bf16.mxu1 %v1875_v4  ;;  %v697_v18 = vadd.f32 %v2133_v23, %v670_v12  ;;  %v673_v19 = vadd.f32 %v1644_v16, %v1624_v14  ;;  %v664_v20 = vpop.f32.mrb[15].mxu0 }
 0x10c   : > { %v695_v21 = vadd.f32 %v2133_v23, %v662_v15  ;;  %v665_v22 = vadd.f32 %v664_v20, %v527_v17 }
 0x10d   : > { %v698_v24 = vadd.f32 %v2133_v23, %v673_v19 }
 0x10e   : > { %v696_v25 = vadd.f32 %v2133_v23, %v665_v22  ;;  %v1744_v23 = vld [vmem:[%s2436_s5 + $0x30] sm:$0xff]  }
 0x10f   : > { %v706_v26 = vpack.c.bf16 %v698_v24, %v697_v18  ;;  %1556 = vmatpush3.bf16.msra.mxu0 %v1744_v23 }
 0x110   : > { %v705_v27 = vpack.c.bf16 %v696_v25, %v695_v21  ;;  %1557 = vmatprep.subr.bf16.mxu0 %v1745_v29 }
 0x112   : > { %878 = vmatmul.mubr.bf16.gmra.mrb[28].mxu1 %v702_v53 }
 0x113   : > { %887 = vmatprep.mubr.bf16.mxu1 %v1875_v4  ;;  %1558 = vmatpush3.bf16.msra.mxu0 %v1746_v30 }
 0x11a   : > { %888 = vmatmul.mubr.bf16.gmra.mrb[32].mxu1 %v703_v9 }
 0x11b   : > { %897 = vmatprep.mubr.bf16.mxu1 %v1875_v4 }
 0x122   : > { %898 = vmatmul.mubr.bf16.gmra.mrb[36].mxu1 %v704_v8 }
 0x123   : > { %907 = vmatprep.mubr.bf16.mxu1 %v1875_v4 }
 0x12a   : > { %908 = vmatmul.mubr.bf16.gmra.mrb[40].mxu1 %v705_v27 }
 0x12b   : > { %917 = vmatprep.mubr.bf16.mxu1 %v1875_v4  ;;  %v725_v4 = vlaneseq }
 0x12d   : > { %v726_v31 = vshrl.u32 %v725_v4, 7 }
 0x12f   : > { %v727_v32 = vsub.s32 0, %v726_v31  ;;  %v731_v34 = vsub.s32 1, %v726_v31 }
 0x131   : > { %v2173_v35 = vrot.slane %v723_v33, %v727_v32  ;;  %v2175_v36 = vrot.slane %v723_v33, %v731_v34 }
 0x132   : > { %918 = vmatmul.mubr.bf16.gmra.mrb[44].mxu1 %v706_v26 }
 0x1cd   : > { %v849_v37 = vpop.f32.mrb[16].mxu1 }
 0x1ce   : > { %v850_v38 = vadd.f32 %v849_v37, %v2173_v35  ;;  %v851_v39 = vpop.f32.mrb[17].mxu1 }
 0x1cf   : > { %v852_v40 = vadd.f32 %v851_v39, %v2175_v36  ;;  %v853_v41 = vpop.f32.mrb[18].mxu1 }
 0x1d0   : > { %v854_v42 = vadd.f32 %v853_v41, %v2173_v35  ;;  %v855_v43 = vpop.f32.mrb[19].mxu1  ;;  %v928_v45 = vmax.f32 %v850_v38, 0.0 }
 0x1d1   : > { %v856_v44 = vadd.f32 %v855_v43, %v2175_v36  ;;  %v929_v47 = vmax.f32 %v852_v40, 0.0 }
 0x1d2   : > { %v930_v46 = vmax.f32 %v854_v42, 0.0 }
 0x1d3   : > { %v931_v48 = vmax.f32 %v856_v44, 0.0 }
 0x1d4   : > { %v960_v49 = vpack.c.bf16 %v930_v46, %v928_v45 }
 0x1d5   : > { %v961_v50 = vpack.c.bf16 %v931_v48, %v929_v47  ;;  %v859_v51 = vpop.f32.mrb[20].mxu1 }
 0x1d6   : > { %v860_v52 = vadd.f32 %v859_v51, %v2173_v35  ;;  %v861_v53 = vpop.f32.mrb[21].mxu1 }
 0x1d7   : > { %v862_v54 = vadd.f32 %v861_v53, %v2175_v36  ;;  %v863_v55 = vpop.f32.mrb[22].mxu1  ;;  %1143 = vmatprep.mubr.bf16.mxu0 %v961_v50 }
 0x1d8   : > { %v864_v56 = vadd.f32 %v863_v55, %v2173_v35  ;;  %v865_v57 = vpop.f32.mrb[23].mxu1  ;;  %1144 = vmatmul.mubr.bf16.vlgmr.msra.gmra.mrb[16].mxu0 %v960_v49  ;;  %v932_v59 = vmax.f32 %v860_v52, 0.0 }
 0x1d9   : > { %v866_v58 = vadd.f32 %v865_v57, %v2175_v36  ;;  %v933_v61 = vmax.f32 %v862_v54, 0.0 }
 0x1da   : > { %v934_v60 = vmax.f32 %v864_v56, 0.0 }
 0x1db   : > { %v935_v62 = vmax.f32 %v866_v58, 0.0 }
 0x1dc   : > { %v962_v63 = vpack.c.bf16 %v934_v60, %v932_v59 }
 0x1dd   : > { %v963_v0 = vpack.c.bf16 %v935_v62, %v933_v61  ;;  %v869_v1 = vpop.f32.mrb[24].mxu1 }
 0x1de   : > { %v870_v2 = vadd.f32 %v869_v1, %v2173_v35  ;;  %v871_v3 = vpop.f32.mrb[25].mxu1 }
 0x1df   : > { %v872_v5 = vadd.f32 %v871_v3, %v2175_v36  ;;  %v873_v6 = vpop.f32.mrb[26].mxu1  ;;  %1151 = vmatprep.mubr.bf16.mxu0 %v963_v0 }
 0x1e0   : > { %v874_v7 = vadd.f32 %v873_v6, %v2173_v35  ;;  %v875_v8 = vpop.f32.mrb[27].mxu1  ;;  %1152 = vmatmul.mubr.bf16.gmra.mrb[20].mxu0 %v962_v63  ;;  %v936_v10 = vmax.f32 %v870_v2, 0.0 }
 0x1e1   : > { %v876_v9 = vadd.f32 %v875_v8, %v2175_v36  ;;  %v937_v12 = vmax.f32 %v872_v5, 0.0 }
 0x1e2   : > { %v938_v11 = vmax.f32 %v874_v7, 0.0 }
 0x1e3   : > { %v939_v13 = vmax.f32 %v876_v9, 0.0 }
 0x1e4   : > { %v964_v14 = vpack.c.bf16 %v938_v11, %v936_v10 }
 0x1e5   : > { %v965_v15 = vpack.c.bf16 %v939_v13, %v937_v12  ;;  %v879_v16 = vpop.f32.mrb[28].mxu1 }
 0x1e6   : > { %v880_v17 = vadd.f32 %v879_v16, %v2173_v35  ;;  %v881_v18 = vpop.f32.mrb[29].mxu1 }
 0x1e7   : > { %v882_v19 = vadd.f32 %v881_v18, %v2175_v36  ;;  %v883_v20 = vpop.f32.mrb[30].mxu1  ;;  %1159 = vmatprep.mubr.bf16.mxu0 %v965_v15 }
 0x1e8   : > { %v884_v21 = vadd.f32 %v883_v20, %v2173_v35  ;;  %v885_v22 = vpop.f32.mrb[31].mxu1  ;;  %1160 = vmatmul.mubr.bf16.gmra.mrb[24].mxu0 %v964_v14  ;;  %v940_v25 = vmax.f32 %v880_v17, 0.0 }
 0x1e9   : > { %v886_v24 = vadd.f32 %v885_v22, %v2175_v36  ;;  %v941_v27 = vmax.f32 %v882_v19, 0.0 }
 0x1ea   : > { %v942_v26 = vmax.f32 %v884_v21, 0.0 }
 0x1eb   : > { %v943_v28 = vmax.f32 %v886_v24, 0.0 }
 0x1ec   : > { %v966_v23 = vpack.c.bf16 %v942_v26, %v940_v25 }
 0x1ed   : > { %v967_v29 = vpack.c.bf16 %v943_v28, %v941_v27  ;;  %v889_v30 = vpop.f32.mrb[32].mxu1  ;;  %v2212_v27 = vld [vmem:[%s2439_s8] ss:$0 sm:$0xff] }
 0x1ee   : > { %v890_v4 = vadd.f32 %v889_v30, %v2173_v35  ;;  %v891_v31 = vpop.f32.mrb[33].mxu1 }
 0x1ef   : > { %v892_v32 = vadd.f32 %v891_v31, %v2175_v36  ;;  %v893_v33 = vpop.f32.mrb[34].mxu1  ;;  %1167 = vmatprep.mubr.bf16.mxu0 %v967_v29 }
 0x1f0   : > { %v894_v34 = vadd.f32 %v893_v33, %v2173_v35  ;;  %v895_v37 = vpop.f32.mrb[35].mxu1  ;;  %1168 = vmatmul.mubr.bf16.gmra.mrb[28].mxu0 %v966_v23  ;;  %v944_v39 = vmax.f32 %v890_v4, 0.0 }
 0x1f1   : > { %v896_v38 = vadd.f32 %v895_v37, %v2175_v36  ;;  %v945_v41 = vmax.f32 %v892_v32, 0.0 }
 0x1f2   : > { %v946_v40 = vmax.f32 %v894_v34, 0.0 }
 0x1f3   : > { %v947_v42 = vmax.f32 %v896_v38, 0.0 }
 0x1f4   : > { %v968_v43 = vpack.c.bf16 %v946_v40, %v944_v39 }
 0x1f5   : > { %v969_v44 = vpack.c.bf16 %v947_v42, %v945_v41  ;;  %v899_v45 = vpop.f32.mrb[36].mxu1 }
 0x1f6   : > { %v900_v46 = vadd.f32 %v899_v45, %v2173_v35  ;;  %v901_v47 = vpop.f32.mrb[37].mxu1 }
 0x1f7   : > { %v902_v48 = vadd.f32 %v901_v47, %v2175_v36  ;;  %v903_v49 = vpop.f32.mrb[38].mxu1  ;;  %1175 = vmatprep.mubr.bf16.mxu0 %v969_v44 }
 0x1f8   : > { %v904_v50 = vadd.f32 %v903_v49, %v2173_v35  ;;  %v905_v51 = vpop.f32.mrb[39].mxu1  ;;  %1176 = vmatmul.mubr.bf16.gmra.mrb[32].mxu0 %v968_v43  ;;  %v948_v53 = vmax.f32 %v900_v46, 0.0 }
 0x1f9   : > { %v906_v52 = vadd.f32 %v905_v51, %v2175_v36  ;;  %v949_v55 = vmax.f32 %v902_v48, 0.0 }
 0x1fa   : > { %v950_v54 = vmax.f32 %v904_v50, 0.0 }
 0x1fb   : > { %v951_v56 = vmax.f32 %v906_v52, 0.0 }
 0x1fc   : > { %v970_v57 = vpack.c.bf16 %v950_v54, %v948_v53 }
 0x1fd   : > { %v971_v58 = vpack.c.bf16 %v951_v56, %v949_v55  ;;  %v909_v59 = vpop.f32.mrb[40].mxu1 }
 0x1fe   : > { %v910_v60 = vadd.f32 %v909_v59, %v2173_v35  ;;  %v911_v61 = vpop.f32.mrb[41].mxu1 }
 0x1ff   : > { %v912_v62 = vadd.f32 %v911_v61, %v2175_v36  ;;  %v913_v63 = vpop.f32.mrb[42].mxu1  ;;  %1183 = vmatprep.mubr.bf16.mxu0 %v971_v58 }
 0x200   : > { %v914_v0 = vadd.f32 %v913_v63, %v2173_v35  ;;  %v915_v1 = vpop.f32.mrb[43].mxu1  ;;  %1184 = vmatmul.mubr.bf16.gmra.mrb[36].mxu0 %v970_v57  ;;  %v952_v3 = vmax.f32 %v910_v60, 0.0 }
 0x201   : > { %v916_v2 = vadd.f32 %v915_v1, %v2175_v36  ;;  %v953_v6 = vmax.f32 %v912_v62, 0.0 }
 0x202   : > { %v954_v5 = vmax.f32 %v914_v0, 0.0 }
 0x203   : > { %v955_v7 = vmax.f32 %v916_v2, 0.0 }
 0x204   : > { %v972_v8 = vpack.c.bf16 %v954_v5, %v952_v3 }
 0x205   : > { %v973_v9 = vpack.c.bf16 %v955_v7, %v953_v6  ;;  %v919_v10 = vpop.f32.mrb[44].mxu1 }
 0x206   : > { %v920_v11 = vadd.f32 %v919_v10, %v2173_v35  ;;  %v921_v12 = vpop.f32.mrb[45].mxu1 }
 0x207   : > { %v922_v13 = vadd.f32 %v921_v12, %v2175_v36  ;;  %v923_v14 = vpop.f32.mrb[46].mxu1  ;;  %1191 = vmatprep.mubr.bf16.mxu0 %v973_v9 }
 0x208   : > { %v924_v15 = vadd.f32 %v923_v14, %v2173_v35  ;;  %v925_v16 = vpop.f32.mrb[47].mxu1  ;;  %1192 = vmatmul.mubr.bf16.gmra.mrb[40].mxu0 %v972_v8  ;;  %v956_v18 = vmax.f32 %v920_v11, 0.0 }
 0x209   : > { %v926_v17 = vadd.f32 %v925_v16, %v2175_v36  ;;  %v957_v20 = vmax.f32 %v922_v13, 0.0 }
 0x20a   : > { %v958_v19 = vmax.f32 %v924_v15, 0.0 }
 0x20b   : > { %v959_v21 = vmax.f32 %v926_v17, 0.0 }
 0x20c   : > { %v974_v22 = vpack.c.bf16 %v958_v19, %v956_v18 }
 0x20d   : > { %v975_v24 = vpack.c.bf16 %v959_v21, %v957_v20 }
 0x20f   : > { %1199 = vmatprep.mubr.bf16.mxu0 %v975_v24 }
 0x210   : > { %1200 = vmatmul.mubr.bf16.gmra.mrb[44].mxu0 %v974_v22 }
 0x2ab   : > { %v1559_v25 = vpop.f32.mrb[16].mxu0 }
 0x2ac   : > { %v1560_v26 = vpop.f32.mrb[17].mxu0 }
 0x2ad   : > { %v1561_v35 = vadd.f32 %v1560_v26, %v1559_v25  ;;  %v1562_v28 = vpop.f32.mrb[18].mxu0 }
 0x2ae   : > { %v1563_v23 = vpop.f32.mrb[19].mxu0 }
 0x2af   : > { %v1564_v29 = vadd.f32 %v1563_v23, %v1562_v28  ;;  %v2215_v36 = vadd.f32 %v1561_v35, %v2212_v27 }
 0x2b1   : > { %1208 = vmax.xlane.f32.xlu0 %v2215_v36  ;;  %v2219_v4 = vadd.f32 %v1564_v29, %v2212_v27 }
 0x2b3   : > { %v1565_v30 = vpop.f32.mrb[20].mxu0 }
 0x2b4   : > { %v1566_v31 = vpop.f32.mrb[21].mxu0 }
 0x2b5   : > { %v1567_v32 = vadd.f32 %v1566_v31, %v1565_v30  ;;  %v1568_v33 = vpop.f32.mrb[22].mxu0  ;;  %1210 = vmax.xlane.f32.xlu0 %v2219_v4 }
 0x2b6   : > { %v1569_v34 = vpop.f32.mrb[23].mxu0 }
 0x2b7   : > { %v1570_v37 = vadd.f32 %v1569_v34, %v1568_v33  ;;  %v2223_v38 = vadd.f32 %v1567_v32, %v2212_v27 }
 0x2b9   : > { %1212 = vmax.xlane.f32.xlu1 %v2223_v38  ;;  %v2227_v40 = vadd.f32 %v1570_v37, %v2212_v27 }
 0x2bb   : > { %v1571_v39 = vpop.f32.mrb[24].mxu0 }
 0x2bc   : > { %v1572_v41 = vpop.f32.mrb[25].mxu0 }
 0x2bd   : > { %v1573_v42 = vadd.f32 %v1572_v41, %v1571_v39  ;;  %v1574_v43 = vpop.f32.mrb[26].mxu0  ;;  %1214 = vmax.xlane.f32.xlu1 %v2227_v40 }
 0x2be   : > { %v1575_v44 = vpop.f32.mrb[27].mxu0 }
 0x2bf   : > { %v1576_v45 = vadd.f32 %v1575_v44, %v1574_v43  ;;  %v2231_v46 = vadd.f32 %v1573_v42, %v2212_v27 }
 0x2c1   : > { %1216 = vmax.xlane.f32.xlu0 %v2231_v46  ;;  %v2235_v47 = vadd.f32 %v1576_v45, %v2212_v27 }
 0x2c3   : > { %v1577_v48 = vpop.f32.mrb[28].mxu0  ;;  %1218 = vmax.xlane.f32.xlu1 %v2235_v47 }
 0x2c4   : > { %v1578_v49 = vpop.f32.mrb[29].mxu0 }
 0x2c5   : > { %v1579_v50 = vadd.f32 %v1578_v49, %v1577_v48  ;;  %v1580_v51 = vpop.f32.mrb[30].mxu0 }
 0x2c6   : > { %v1581_v52 = vpop.f32.mrb[31].mxu0 }
 0x2c7   : > { %v1582_v53 = vadd.f32 %v1581_v52, %v1580_v51  ;;  %v2239_v54 = vadd.f32 %v1579_v50, %v2212_v27 }
 0x2c9   : > { %1220 = vmax.xlane.f32.xlu0 %v2239_v54  ;;  %v2243_v55 = vadd.f32 %v1582_v53, %v2212_v27 }
 0x2cb   : > { %v1583_v56 = vpop.f32.mrb[32].mxu0  ;;  %1222 = vmax.xlane.f32.xlu1 %v2243_v55 }
 0x2cc   : > { %v1584_v57 = vpop.f32.mrb[33].mxu0 }
 0x2cd   : > { %v1585_v58 = vadd.f32 %v1584_v57, %v1583_v56  ;;  %v1586_v59 = vpop.f32.mrb[34].mxu0 }
 0x2ce   : > { %v1587_v60 = vpop.f32.mrb[35].mxu0 }
 0x2cf   : > { %v1588_v61 = vadd.f32 %v1587_v60, %v1586_v59  ;;  %v2247_v62 = vadd.f32 %v1585_v58, %v2212_v27 }
 0x2d1   : > { %1224 = vmax.xlane.f32.xlu0 %v2247_v62  ;;  %v2251_v63 = vadd.f32 %v1588_v61, %v2212_v27 }
 0x2d3   : > { %v1589_v0 = vpop.f32.mrb[36].mxu0  ;;  %1226 = vmax.xlane.f32.xlu1 %v2251_v63 }
 0x2d4   : > { %v1590_v1 = vpop.f32.mrb[37].mxu0 }
 0x2d5   : > { %v1591_v2 = vadd.f32 %v1590_v1, %v1589_v0  ;;  %v1592_v3 = vpop.f32.mrb[38].mxu0 }
 0x2d6   : > { %v1593_v5 = vpop.f32.mrb[39].mxu0 }
 0x2d7   : > { %v1594_v6 = vadd.f32 %v1593_v5, %v1592_v3  ;;  %v2255_v7 = vadd.f32 %v1591_v2, %v2212_v27 }
 0x2d9   : > { %1228 = vmax.xlane.f32.xlu0 %v2255_v7  ;;  %v2259_v8 = vadd.f32 %v1594_v6, %v2212_v27 }
 0x2db   : > { %v1595_v9 = vpop.f32.mrb[40].mxu0  ;;  %1230 = vmax.xlane.f32.xlu1 %v2259_v8 }
 0x2dc   : > { %v1596_v10 = vpop.f32.mrb[41].mxu0 }
 0x2dd   : > { %v1597_v11 = vadd.f32 %v1596_v10, %v1595_v9  ;;  %v1598_v12 = vpop.f32.mrb[42].mxu0 }
 0x2de   : > { %v1599_v13 = vpop.f32.mrb[43].mxu0 }
 0x2df   : > { %v1600_v14 = vadd.f32 %v1599_v13, %v1598_v12  ;;  %v2263_v15 = vadd.f32 %v1597_v11, %v2212_v27 }
 0x2e1   : > { %1232 = vmax.xlane.f32.xlu0 %v2263_v15  ;;  %v2267_v16 = vadd.f32 %v1600_v14, %v2212_v27 }
 0x2e3   : > { %v1601_v17 = vpop.f32.mrb[44].mxu0  ;;  %1234 = vmax.xlane.f32.xlu1 %v2267_v16 }
 0x2e4   : > { %v1602_v18 = vpop.f32.mrb[45].mxu0 }
 0x2e5   : > { %v1603_v19 = vadd.f32 %v1602_v18, %v1601_v17  ;;  %v1604_v20 = vpop.f32.mrb[46].mxu0 }
 0x2e6   : > { %v1605_v21 = vpop.f32.mrb[47].mxu0 }
 0x2e7   : > { %v1606_v22 = vadd.f32 %v1605_v21, %v1604_v20  ;;  %v2271_v24 = vadd.f32 %v1603_v19, %v2212_v27 }
 0x2e9   : > { %1236 = vmax.xlane.f32.xlu0 %v2271_v24  ;;  %v2275_v25 = vadd.f32 %v1606_v22, %v2212_v27 }
 0x2eb   : > { %1238 = vmax.xlane.f32.xlu1 %v2275_v25 }
 0x33e   : > { %v1209_v26 = vpop.xlane.xlu0 %1208 }
 0x33f   : > { %v1240_v35 = vsub.f32 %v2215_v36, %v1209_v26 }
 0x341   : > { %v1256_v28 = vmul.f32 1.442695, %v1240_v35 }
 0x342   : > { %v1211_v23 = vpop.xlane.xlu0 %1210 }
 0x343   : > { %1747 = vpow2.f32 %v1256_v28  ;;  %v1241_v29 = vsub.f32 %v2219_v4, %v1211_v23 }
 0x345   : > { %v1258_v30 = vmul.f32 1.442695, %v1241_v29 }
 0x346   : > { %v1213_v31 = vpop.xlane.xlu1 %1212 }
 0x347   : > { %1749 = vpow2.f32 %v1258_v30  ;;  %v1242_v32 = vsub.f32 %v2223_v38, %v1213_v31 }
 0x349   : > { %v1260_v33 = vmul.f32 1.442695, %v1242_v32 }
 0x34a   : > { %v1215_v34 = vpop.xlane.xlu1 %1214 }
 0x34b   : > { %1751 = vpow2.f32 %v1260_v33  ;;  %v1243_v27 = vsub.f32 %v2227_v40, %v1215_v34 }
 0x34d   : > { %v2282_v37 = vpop.eup %1747  ;;  %v1262_v39 = vmul.f32 1.442695, %v1243_v27 }
 0x34e   : > { %1288 = vadd.xlane.f32.xlu0 %v2282_v37  ;;  %v1217_v36 = vpop.xlane.xlu0 %1216 }
 0x34f   : > { %1753 = vpow2.f32 %v1262_v39  ;;  %v1244_v41 = vsub.f32 %v2231_v46, %v1217_v36 }
 0x350   : > { %v1219_v4 = vpop.xlane.xlu1 %1218 }
 0x351   : > { %v2286_v42 = vpop.eup %1749  ;;  %v1264_v43 = vmul.f32 1.442695, %v1244_v41  ;;  %v1245_v38 = vsub.f32 %v2235_v47, %v1219_v4 }
 0x352   : > { %1290 = vadd.xlane.f32.xlu1 %v2286_v42 }
 0x353   : > { %1755 = vpow2.f32 %v1264_v43  ;;  %v1266_v44 = vmul.f32 1.442695, %v1245_v38 }
 0x355   : > { %v2290_v40 = vpop.eup %1751  ;;  %1757 = vpow2.f32 %v1266_v44 }
 0x356   : > { %1292 = vadd.xlane.f32.xlu0 %v2290_v40  ;;  %v1221_v45 = vpop.xlane.xlu0 %1220 }
 0x357   : > { %v1246_v48 = vsub.f32 %v2239_v54, %v1221_v45 }
 0x358   : > { %v1223_v49 = vpop.xlane.xlu1 %1222 }
 0x359   : > { %v2294_v46 = vpop.eup %1753  ;;  %v1268_v50 = vmul.f32 1.442695, %v1246_v48  ;;  %v1247_v51 = vsub.f32 %v2243_v55, %v1223_v49 }
 0x35a   : > { %1294 = vadd.xlane.f32.xlu1 %v2294_v46 }
 0x35b   : > { %1759 = vpow2.f32 %v1268_v50  ;;  %v1270_v47 = vmul.f32 1.442695, %v1247_v51 }
 0x35d   : > { %v2298_v52 = vpop.eup %1755  ;;  %1761 = vpow2.f32 %v1270_v47 }
 0x35e   : > { %1296 = vadd.xlane.f32.xlu0 %v2298_v52  ;;  %v1225_v53 = vpop.xlane.xlu0 %1224 }
 0x35f   : > { %v2301_v56 = vpop.eup %1757  ;;  %v1248_v54 = vsub.f32 %v2247_v62, %v1225_v53 }
 0x360   : > { %v1227_v57 = vpop.xlane.xlu1 %1226  ;;  %1298 = vadd.xlane.f32.xlu1 %v2301_v56 }
 0x361   : > { %v1272_v58 = vmul.f32 1.442695, %v1248_v54  ;;  %v1249_v55 = vsub.f32 %v2251_v63, %v1227_v57 }
 0x363   : > { %1763 = vpow2.f32 %v1272_v58  ;;  %v1274_v59 = vmul.f32 1.442695, %v1249_v55 }
 0x365   : > { %v2306_v60 = vpop.eup %1759  ;;  %1765 = vpow2.f32 %v1274_v59 }
 0x366   : > { %1300 = vadd.xlane.f32.xlu0 %v2306_v60  ;;  %v1229_v61 = vpop.xlane.xlu0 %1228 }
 0x367   : > { %v2309_v0 = vpop.eup %1761  ;;  %v1250_v1 = vsub.f32 %v2255_v7, %v1229_v61 }
 0x368   : > { %v1231_v2 = vpop.xlane.xlu1 %1230  ;;  %1302 = vadd.xlane.f32.xlu1 %v2309_v0 }
 0x369   : > { %v1276_v62 = vmul.f32 1.442695, %v1250_v1  ;;  %v1251_v3 = vsub.f32 %v2259_v8, %v1231_v2 }
 0x36b   : > { %1767 = vpow2.f32 %v1276_v62  ;;  %v1278_v63 = vmul.f32 1.442695, %v1251_v3 }
 0x36d   : > { %v2314_v5 = vpop.eup %1763  ;;  %1769 = vpow2.f32 %v1278_v63 }
 0x36e   : > { %1304 = vadd.xlane.f32.xlu0 %v2314_v5  ;;  %v1233_v6 = vpop.xlane.xlu0 %1232 }
 0x36f   : > { %v2317_v9 = vpop.eup %1765  ;;  %v1252_v10 = vsub.f32 %v2263_v15, %v1233_v6 }
 0x370   : > { %v1235_v11 = vpop.xlane.xlu1 %1234  ;;  %1306 = vadd.xlane.f32.xlu1 %v2317_v9 }
 0x371   : > { %v1280_v7 = vmul.f32 1.442695, %v1252_v10  ;;  %v1253_v12 = vsub.f32 %v2267_v16, %v1235_v11 }
 0x373   : > { %1771 = vpow2.f32 %v1280_v7  ;;  %v1282_v8 = vmul.f32 1.442695, %v1253_v12 }
 0x375   : > { %v2322_v13 = vpop.eup %1767  ;;  %1773 = vpow2.f32 %v1282_v8 }
 0x376   : > { %1308 = vadd.xlane.f32.xlu0 %v2322_v13  ;;  %v1237_v14 = vpop.xlane.xlu0 %1236 }
 0x377   : > { %v2325_v17 = vpop.eup %1769  ;;  %v1254_v18 = vsub.f32 %v2271_v24, %v1237_v14 }
 0x378   : > { %v1239_v19 = vpop.xlane.xlu1 %1238  ;;  %1310 = vadd.xlane.f32.xlu1 %v2325_v17 }
 0x379   : > { %v1284_v15 = vmul.f32 1.442695, %v1254_v18  ;;  %v1255_v20 = vsub.f32 %v2275_v25, %v1239_v19 }
 0x37b   : > { %1775 = vpow2.f32 %v1284_v15  ;;  %v1286_v16 = vmul.f32 1.442695, %v1255_v20 }
 0x37d   : > { %v2330_v21 = vpop.eup %1771  ;;  %1777 = vpow2.f32 %v1286_v16 }
 0x37e   : > { %1312 = vadd.xlane.f32.xlu0 %v2330_v21 }
 0x37f   : > { %v2333_v22 = vpop.eup %1773 }
 0x380   : > { %1314 = vadd.xlane.f32.xlu1 %v2333_v22 }
 0x385   : > { %v2336_v24 = vpop.eup %1775 }
 0x386   : > { %1316 = vadd.xlane.f32.xlu0 %v2336_v24 }
 0x387   : > { %v2339_v26 = vpop.eup %1777 }
 0x388   : > { %1318 = vadd.xlane.f32.xlu1 %v2339_v26 }
 0x3db   : > { %v1289_v25 = vpop.xlane.xlu0 %1288 }
 0x3dc   : > { %1779 = vrcp.f32 %v1289_v25 }
 0x3df   : > { %v1291_v35 = vpop.xlane.xlu1 %1290 }
 0x3e0   : > { %1781 = vrcp.f32 %v1291_v35 }
 0x3e3   : > { %v1293_v28 = vpop.xlane.xlu0 %1292 }
 0x3e4   : > { %1783 = vrcp.f32 %v1293_v28 }
 0x3e6   : > { %v1780_v23 = vpop.eup %1779 }
 0x3e7   : > { %v1321_v29 = vmul.f32 %v1780_v23, %v2282_v37  ;;  %v1295_v30 = vpop.xlane.xlu1 %1294 }
 0x3e8   : > { %1785 = vrcp.f32 %v1295_v30 }
 0x3e9   : > { %1352 = vst [vmem:[%s2346_s21] sm:$0xff] %v1321_v29 }
 0x3ea   : > { %v1782_v31 = vpop.eup %1781 }
 0x3eb   : > { %v1323_v32 = vmul.f32 %v1782_v31, %v2286_v42  ;;  %v1297_v33 = vpop.xlane.xlu0 %1296 }
 0x3ec   : > { %1787 = vrcp.f32 %v1297_v33 }
 0x3ed   : > { %1353 = vst [vmem:[%s2346_s21 + $0x8] sm:$0xff] %v1323_v32  ;;  %v1299_v34 = vpop.xlane.xlu1 %1298 }
 0x3ee   : > { %v1784_v27 = vpop.eup %1783  ;;  %1789 = vrcp.f32 %v1299_v34 }
 0x3ef   : > { %v1325_v37 = vmul.f32 %v1784_v27, %v2290_v40 }
 0x3f1   : > { %1354 = vst [vmem:[%s2346_s21 + $0x10] sm:$0xff] %v1325_v37 }
 0x3f2   : > { %v1786_v39 = vpop.eup %1785 }
 0x3f3   : > { %v1327_v36 = vmul.f32 %v1786_v39, %v2294_v46  ;;  %v1301_v41 = vpop.xlane.xlu0 %1300 }
 0x3f4   : > { %1791 = vrcp.f32 %v1301_v41 }
 0x3f5   : > { %1355 = vst [vmem:[%s2346_s21 + $0x18] sm:$0xff] %v1327_v36  ;;  %v1303_v4 = vpop.xlane.xlu1 %1302 }
 0x3f6   : > { %v1788_v42 = vpop.eup %1787  ;;  %1793 = vrcp.f32 %v1303_v4 }
 0x3f7   : > { %v1329_v43 = vmul.f32 %v1788_v42, %v2298_v52 }
 0x3f8   : > { %v1790_v38 = vpop.eup %1789 }
 0x3f9   : > { %1356 = vst [vmem:[%s2346_s21 + $0x20] sm:$0xff] %v1329_v43  ;;  %v1331_v44 = vmul.f32 %v1790_v38, %v2301_v56 }
 0x3fb   : > { %1357 = vst [vmem:[%s2346_s21 + $0x28] sm:$0xff] %v1331_v44  ;;  %v1305_v40 = vpop.xlane.xlu0 %1304 }
 0x3fc   : > { %1795 = vrcp.f32 %v1305_v40 }
 0x3fd   : > { %v1307_v45 = vpop.xlane.xlu1 %1306 }
 0x3fe   : > { %v1792_v48 = vpop.eup %1791  ;;  %1797 = vrcp.f32 %v1307_v45 }
 0x3ff   : > { %v1333_v49 = vmul.f32 %v1792_v48, %v2306_v60 }
 0x400   : > { %v1794_v46 = vpop.eup %1793 }
 0x401   : > { %1358 = vst [vmem:[%s2346_s21 + $0x30] sm:$0xff] %v1333_v49  ;;  %v1335_v50 = vmul.f32 %v1794_v46, %v2309_v0 }
 0x403   : > { %1359 = vst [vmem:[%s2346_s21 + $0x38] sm:$0xff] %v1335_v50  ;;  %v1309_v51 = vpop.xlane.xlu0 %1308 }
 0x404   : > { %1799 = vrcp.f32 %v1309_v51 }
 0x405   : > { %v1311_v47 = vpop.xlane.xlu1 %1310 }
 0x406   : > { %v1796_v52 = vpop.eup %1795  ;;  %1801 = vrcp.f32 %v1311_v47 }
 0x407   : > { %v1337_v53 = vmul.f32 %v1796_v52, %v2314_v5 }
 0x408   : > { %v1798_v56 = vpop.eup %1797 }
 0x409   : > { %1360 = vst [vmem:[%s2346_s21 + $0x40] sm:$0xff] %v1337_v53  ;;  %v1339_v54 = vmul.f32 %v1798_v56, %v2317_v9 }
 0x40b   : > { %1361 = vst [vmem:[%s2346_s21 + $0x48] sm:$0xff] %v1339_v54  ;;  %v1313_v57 = vpop.xlane.xlu0 %1312 }
 0x40c   : > { %1803 = vrcp.f32 %v1313_v57 }
 0x40d   : > { %v1315_v58 = vpop.xlane.xlu1 %1314 }
 0x40e   : > { %v1800_v55 = vpop.eup %1799  ;;  %1805 = vrcp.f32 %v1315_v58 }
 0x40f   : > { %v1341_v59 = vmul.f32 %v1800_v55, %v2322_v13 }
 0x410   : > { %v1802_v60 = vpop.eup %1801 }
 0x411   : > { %1362 = vst [vmem:[%s2346_s21 + $0x50] sm:$0xff] %v1341_v59  ;;  %v1343_v61 = vmul.f32 %v1802_v60, %v2325_v17 }
 0x413   : > { %1363 = vst [vmem:[%s2346_s21 + $0x58] sm:$0xff] %v1343_v61  ;;  %v1317_v0 = vpop.xlane.xlu0 %1316 }
 0x414   : > { %1807 = vrcp.f32 %v1317_v0 }
 0x415   : > { %v1319_v1 = vpop.xlane.xlu1 %1318 }
 0x416   : > { %v1804_v2 = vpop.eup %1803  ;;  %1809 = vrcp.f32 %v1319_v1 }
 0x417   : > { %v1345_v62 = vmul.f32 %v1804_v2, %v2330_v21 }
 0x418   : > { %v1806_v3 = vpop.eup %1805 }
 0x419   : > { %1364 = vst [vmem:[%s2346_s21 + $0x60] sm:$0xff] %v1345_v62  ;;  %v1347_v63 = vmul.f32 %v1806_v3, %v2333_v22 }
 0x41b   : > { %1365 = vst [vmem:[%s2346_s21 + $0x68] sm:$0xff] %v1347_v63 }
 0x41e   : > { %v1808_v5 = vpop.eup %1807 }
 0x41f   : > { %v1349_v6 = vmul.f32 %v1808_v5, %v2336_v24 }
 0x420   : > { %v1810_v9 = vpop.eup %1809 }
 0x421   : > { %1366 = vst [vmem:[%s2346_s21 + $0x70] sm:$0xff] %v1349_v6  ;;  %v1351_v10 = vmul.f32 %v1810_v9, %v2339_v26 }
 0x423   : > { %1367 = vst [vmem:[%s2346_s21 + $0x78] sm:$0xff] %v1351_v10 }
 0x424   : > { %1824 = shalt.err (!%p1821_p3)
}
 0x425   : > { %s1825_s26 = scalar_lea.hbm %s2381_s14, 2048  ;;  %s1829_s24 = scalar_lea.hbm %s2440_s9, 4096 }
 0x426   : > { %p1826_p4 = scmp.ne.s32.totalorder %s2381_s14, %s1825_s26  ;;  %p1830_p9 = scmp.lt.u32.totalorder %s2381_s14, %s2440_s9 }
 0x427   : > { %p1831_p10 = scmp.lt.u32.totalorder %s1829_s24, %s1825_s26  ;;  %p1833_p12 = scmp.lt.u32.totalorder %s1825_s26, %s2381_s14 }
 0x428   : > { %p1827_p7 = pnand %p1826_p4, %p1967_p5 }
 0x429   : > { %p1832_p11 = por %p1831_p10, %p1830_p9 }
 0x42a   : > { %p1828_p8 = pneg %p1827_p7 }
 0x42b   : > { %p1834_p13 = por %p1833_p12, %p1832_p11 }
 0x42d   : > { %p1835_p0 = pnand %p1834_p13, %p1828_p8 }
 0x42f   : > { %1838 = shalt.err (!%p1835_p0)
}
 0x430   : > { %s1877_s16 = smov 128   ;;  %s1878_s17 = smov 8  }
 0x431   : > { %1662 = dma.vmem_to_hbm [thread:$0]  (%p1967_p5), %s2383_s25, 2048, %s2381_s14, %s2390_s13, %s1877_s16, %s1877_s16, %s1878_s17  }
 0x432 PF: > { %p1668_p1 = scmp.ge.s32.totalorder %s1873_s12, 2  ;;  %s1397_s22 = sand.u32 1, %s1861_s30  }
 0x433   : > { %s1398_s23 = scalar_lea.sflag [#allocation3], %s1397_s22 }
 0x434   : > { %p1665_p2 = pnand %p1668_p1, %p1971_p6 }
 0x436   : > { %1856 = dma.done.wait (!%p1665_p2), %s1398_s23, 2048  }
 0x437   : > { %1858 = vsyncadd (!%p1665_p2), %s1398_s23, 4294965248  ;;  %p19_p3 = scmp.ge.s32.totalorder %s1954_s15, 4   ;;  %s2443_s30 = smov %s1865_s10 }
 0x438   : > { %s2444_s10 = smov %s1869_s11  ;;  %s2445_s11 = smov %s1965_s18 }
 0x439   : > { %s2446_s12 = smov %s1954_s15  ;;  %21 = sbr.rel (!%p19_p3) target bundleno = 3 (0x3), region = 94 }
 0x440   :  { %1403 = vsyncpa [#allocation3], 1 }
 0x441   :  { %1405 = vsyncpa [#allocation3 + $0x1], 1 }

</bundles_post_ra>
